<compile_context>
chip_gen: v7x
topology: tpu7x:2x2x1
jax: 0.10.0
libtpu: 0.0.40
codegen_flags: <defaults>
</compile_context>

<pallas_src>
import jax
import jax.numpy as jnp
from jax.experimental import pallas as pl
from jax.experimental.pallas import tpu as pltpu


# ----------------------------- Pallas kernel ------------------------------- #
def greybox_kernel(c0_ref, wu_ref, bwu_ref, w1_ref, b1_ref, m_ref, c_out_ref):
    """Runs the full time recurrence inside one kernel invocation."""
    T = wu_ref.shape[0]
    n_pad = c0_ref.shape[1]

    # Hoisted state-independent per-step terms (single fused drive matmul):
    #   d[i]     = w[i]@Bw + u[i]@Bu + dt*b2   (bias rides on the constant-1 column of wu)
    #   dcorr[i] = d[i]@W1 + b1                (lets h advance with the same fused matmul)
    d = jnp.dot(wu_ref[...], bwu_ref[...], preferred_element_type=jnp.float32)
    dcorr = (jnp.dot(d, w1_ref[...], preferred_element_type=jnp.float32)
             + b1_ref[...])
    add_all = jnp.concatenate([d, dcorr], axis=1)              # (T, n_pad + h_pad)

    # Initial augmented state z0 = [c0 | h0],  h0 = tanh(c0@W1 + b1)
    c0 = c0_ref[...]
    h0 = jnp.tanh(jnp.dot(c0, w1_ref[...], preferred_element_type=jnp.float32)
                  + b1_ref[...])
    z = jnp.concatenate([c0, h0], axis=1)                      # (1, n_pad + h_pad)

    row_id = jax.lax.broadcasted_iota(jnp.int32, (T, n_pad), 0)
    c_all = jnp.zeros((T, n_pad), jnp.float32)

    # Fully-unrolled sequential recurrence: ONE loop-invariant (256,256) MXU RHS per
    # step; carried state stays in vregs.
    # TODO(synk): M could be pinned explicitly in the MXU weight regs via
    # pltpu.matmul_push_rhs / matmul_acc_lhs; here we rely on Mosaic reusing the
    # latched loop-invariant RHS across the unrolled steps.
    for i in range(T):
        zt = (jnp.dot(z, m_ref[...], preferred_element_type=jnp.float32)
              + add_all[i:i + 1, :])
        c_new = zt[:, :n_pad]                                  # = c_{i+1}
        h_new = jnp.tanh(zt[:, n_pad:])                        # = tanh(c_{i+1}@W1 + b1)
        # accumulate rows in vregs -> no per-step masked sub-tile store
        c_all = jnp.where(row_id == i,
                          jnp.broadcast_to(c_new, (T, n_pad)), c_all)
        z = jnp.concatenate([c_new, h_new], axis=1)

    c_out_ref[...] = c_all                                     # single unmasked store


# ------------------------------ wrapper ------------------------------------ #
def _pad2(x, rows, cols):
    out = jnp.zeros((rows, cols), jnp.float32)
    return out.at[:x.shape[0], :x.shape[1]].set(x.astype(jnp.float32))


def greybox_forward(c0, w, u, params, obs_idx, dt=0.1):
    A, Bw, Bu, W1, b1, W2, b2 = params
    T, Dw = w.shape
    Du = u.shape[1]
    N = c0.shape[0]
    H = W1.shape[1]

    lane = 128
    rnd = lambda v: ((v + lane - 1) // lane) * lane
    n_pad, h_pad = rnd(N), rnd(H)
    wu_pad = rnd(Dw + Du + 1)            # +1 constant column carries the dt*b2 bias

    # Exogenous inputs fused along the feature dim: [w | u | 1]
    wu_p = jnp.zeros((T, wu_pad), jnp.float32)
    wu_p = wu_p.at[:, :Dw].set(w.astype(jnp.float32))
    wu_p = wu_p.at[:, Dw:Dw + Du].set(u.astype(jnp.float32))
    wu_p = wu_p.at[:, Dw + Du].set(1.0)

    # Fused drive weight: rows = [Bw ; Bu ; dt*b2]
    bwu_p = jnp.zeros((wu_pad, n_pad), jnp.float32)
    bwu_p = bwu_p.at[:Dw, :N].set(Bw.astype(jnp.float32))
    bwu_p = bwu_p.at[Dw:Dw + Du, :N].set(Bu.astype(jnp.float32))
    bwu_p = bwu_p.at[Dw + Du, :N].set((dt * b2).astype(jnp.float32).reshape(N))

    w1_p = _pad2(W1, n_pad, h_pad)
    b1_p = _pad2(b1, 1, h_pad)
    a_p = _pad2(A, n_pad, n_pad)
    w2_p = _pad2(dt * W2, h_pad, n_pad)            # dt folded here

    # Single loop-invariant transition matrix acting on z = [c | h]:
    #   z @ [[A, A@W1], [dt*W2, dt*W2@W1]]  =  [c@A + h@(dt*W2) | (c@A + h@(dt*W2))@W1]
    # Zero padding keeps all pad lanes of c and h exactly zero through the recurrence.
    m_p = jnp.concatenate(
        [jnp.concatenate([a_p, a_p @ w1_p], axis=1),
         jnp.concatenate([w2_p, w2_p @ w1_p], axis=1)],
        axis=0)                                    # (n_pad + h_pad, n_pad + h_pad)

    c0_p = _pad2(c0.reshape(1, N), 1, n_pad)

    vmem = lambda: pl.BlockSpec(memory_space=pltpu.MemorySpace.VMEM)
    inputs = (c0_p, wu_p, bwu_p, w1_p, b1_p, m_p)

    # Working set << 1 MiB: keep everything whole-array in VMEM, no grid.
    c_pad = pl.pallas_call(
        greybox_kernel,
        out_shape=jax.ShapeDtypeStruct((T, n_pad), jnp.float32),
        in_specs=[vmem() for _ in inputs],
        out_specs=vmem(),
    )(*inputs)

    c = c_pad[:, :N]
    # ObservationModel in the reference module is a pure index-select -> gather here.
    y = c[:, obs_idx]
    return c, y


# --------------------------- pure-JAX reference ----------------------------- #
def greybox_ref(c0, w, u, params, obs_idx, dt=0.1):
    A, Bw, Bu, W1, b1, W2, b2 = params
    c_prev = c0[None, :]
    cs, ys = [], []
    for i in range(w.shape[0]):
        h = jnp.tanh(c_prev @ W1 + b1)
        f_prev = h @ W2 + b2
        c_prev = c_prev @ A + w[i:i + 1] @ Bw + u[i:i + 1] @ Bu + dt * f_prev
        cs.append(c_prev[0])
        ys.append(c_prev[0, obs_idx])
    return jnp.stack(cs), jnp.stack(ys)


# ------------------------------- setup -------------------------------------- #
def make_params(key, N, Dw, Du, H):
    ks = jax.random.split(key, 7)
    # WhiteBox (assumed linear physics step): stable transition + input maps
    A = (0.9 * jnp.eye(N, dtype=jnp.float32)
         + 0.01 * jax.random.normal(ks[0], (N, N), jnp.float32))
    Bw = 0.05 * jax.random.normal(ks[1], (Dw, N), jnp.float32)
    Bu = 0.05 * jax.random.normal(ks[2], (Du, N), jnp.float32)
    # BlackBox(8): Linear(N,8) -> tanh -> Linear(8,N)
    W1 = 0.1 * jax.random.normal(ks[3], (N, H), jnp.float32)
    b1 = 0.01 * jax.random.normal(ks[4], (1, H), jnp.float32)
    W2 = 0.1 * jax.random.normal(ks[5], (H, N), jnp.float32)
    b2 = 0.01 * jax.random.normal(ks[6], (1, N), jnp.float32)
    return A, Bw, Bu, W1, b1, W2, b2


if __name__ == "__main__":
    # ObservationModel(20, 5)  ->  nx * ny = 100 state cells
    N = 20 * 5          # state dimension
    Dw = N              # per-cell exogenous forcing
    Du = 4              # control inputs
    H = 8               # BlackBox(8) hidden width
    T = 8               # number of time steps

    key = jax.random.PRNGKey(0)
    k_c0, k_w, k_u, k_p = jax.random.split(key, 4)

    c0 = jax.random.normal(k_c0, (N,), jnp.float32)
    w = 0.1 * jax.random.normal(k_w, (T, Dw), jnp.float32)
    u = 0.1 * jax.random.normal(k_u, (T, Du), jnp.float32)

    # TODO(synk): obs_idx normally comes from coordinates.npy via observability_idx();
    # replaced by a deterministic index subset here.
    obs_idx = jnp.arange(0, N, 4, dtype=jnp.int32)        # 25 observed cells
    params = make_params(k_p, N, Dw, Du, H)

    c_out, y_out = greybox_forward(c0, w, u, params, obs_idx)
    jax.block_until_ready((c_out, y_out))

    c_ref, y_ref = greybox_ref(c0, w, u, params, obs_idx)
    assert c_out.shape == (T, N) and y_out.shape == (T, obs_idx.shape[0])
    assert jnp.allclose(c_out, c_ref, rtol=1e-3, atol=1e-3)
    assert jnp.allclose(y_out, y_ref, rtol=1e-3, atol=1e-3)

    print("KERNEL_OK")
</pallas_src>

<mosaic_0001>
module attributes {stable_mosaic.version = 11 : i64} {
  func.func @greybox_kernel(%arg0: memref<1x128xf32, #tpu.memory_space<vmem>>, %arg1: memref<8x128xf32, #tpu.memory_space<vmem>>, %arg2: memref<128x128xf32, #tpu.memory_space<vmem>>, %arg3: memref<128x128xf32, #tpu.memory_space<vmem>>, %arg4: memref<1x128xf32, #tpu.memory_space<vmem>>, %arg5: memref<256x256xf32, #tpu.memory_space<vmem>>, %arg6: memref<8x128xf32, #tpu.memory_space<vmem>>) attributes {dimension_semantics = [], scalar_prefetch = 0 : i64, scratch_operands = 0 : i64, tpu.core_type = #tpu.core_type<tc>} {
    %c0 = arith.constant 0 : index
    %c0_0 = arith.constant 0 : index
    %0 = vector.load %arg1[%c0, %c0_0] : memref<8x128xf32, #tpu.memory_space<vmem>>, vector<8x128xf32>
    %c0_1 = arith.constant 0 : index
    %c0_2 = arith.constant 0 : index
    %1 = vector.load %arg2[%c0_1, %c0_2] : memref<128x128xf32, #tpu.memory_space<vmem>>, vector<128x128xf32>
    %cst = arith.constant dense<0.000000e+00> : vector<8x128xf32>
    %2 = tpu.matmul %0, %1, %cst {dimension_numbers = #tpu.dot_dimension_numbers<[1], [0], [0], [1], [0, 0, 1, 1], [], []>} : vector<8x128xf32>, vector<128x128xf32>, vector<8x128xf32> -> vector<8x128xf32>
    %c0_3 = arith.constant 0 : index
    %c0_4 = arith.constant 0 : index
    %3 = vector.load %arg3[%c0_3, %c0_4] : memref<128x128xf32, #tpu.memory_space<vmem>>, vector<128x128xf32>
    %cst_5 = arith.constant dense<0.000000e+00> : vector<8x128xf32>
    %4 = tpu.matmul %2, %3, %cst_5 {dimension_numbers = #tpu.dot_dimension_numbers<[1], [0], [0], [1], [0, 0, 1, 1], [], []>} : vector<8x128xf32>, vector<128x128xf32>, vector<8x128xf32> -> vector<8x128xf32>
    %c0_6 = arith.constant 0 : index
    %c0_7 = arith.constant 0 : index
    %5 = vector.load %arg4[%c0_6, %c0_7] : memref<1x128xf32, #tpu.memory_space<vmem>>, vector<1x128xf32>
    %6 = vector.broadcast %5 : vector<1x128xf32> to vector<8x128xf32>
    %7 = arith.addf %4, %6 : vector<8x128xf32>
    %8 = tpu.concatenate %2, %7 in 1 : vector<8x128xf32>, vector<8x128xf32> -> vector<8x256xf32>
    %c0_8 = arith.constant 0 : index
    %c0_9 = arith.constant 0 : index
    %9 = vector.load %arg0[%c0_8, %c0_9] : memref<1x128xf32, #tpu.memory_space<vmem>>, vector<1x128xf32>
    %c0_10 = arith.constant 0 : index
    %c0_11 = arith.constant 0 : index
    %10 = vector.load %arg3[%c0_10, %c0_11] : memref<128x128xf32, #tpu.memory_space<vmem>>, vector<128x128xf32>
    %cst_12 = arith.constant dense<0.000000e+00> : vector<1x128xf32>
    %11 = tpu.matmul %9, %10, %cst_12 {dimension_numbers = #tpu.dot_dimension_numbers<[1], [0], [0], [1], [0, 0, 1, 1], [], []>} : vector<1x128xf32>, vector<128x128xf32>, vector<1x128xf32> -> vector<1x128xf32>
    %c0_13 = arith.constant 0 : index
    %c0_14 = arith.constant 0 : index
    %12 = vector.load %arg4[%c0_13, %c0_14] : memref<1x128xf32, #tpu.memory_space<vmem>>, vector<1x128xf32>
    %13 = arith.addf %11, %12 : vector<1x128xf32>
    %14 = math.tanh %13 : vector<1x128xf32>
    %15 = tpu.concatenate %9, %14 in 1 : vector<1x128xf32>, vector<1x128xf32> -> vector<1x256xf32>
    %16 = tpu.iota {dimensions = array<i32: 0>} : vector<8x128xi32>
    %cst_15 = arith.constant 0.000000e+00 : f32
    %17 = vector.broadcast %cst_15 : f32 to vector<8x128xf32>
    %c0_16 = arith.constant 0 : index
    %c0_17 = arith.constant 0 : index
    %18 = vector.load %arg5[%c0_16, %c0_17] : memref<256x256xf32, #tpu.memory_space<vmem>>, vector<256x256xf32>
    %cst_18 = arith.constant dense<0.000000e+00> : vector<1x256xf32>
    %19 = tpu.matmul %15, %18, %cst_18 {dimension_numbers = #tpu.dot_dimension_numbers<[1], [0], [0], [1], [0, 0, 1, 1], [], []>} : vector<1x256xf32>, vector<256x256xf32>, vector<1x256xf32> -> vector<1x256xf32>
    %20 = vector.extract_strided_slice %8 {offsets = [0, 0], sizes = [1, 256], strides = [1, 1]} : vector<8x256xf32> to vector<1x256xf32>
    %21 = arith.addf %19, %20 : vector<1x256xf32>
    %22 = vector.extract_strided_slice %21 {offsets = [0, 0], sizes = [1, 128], strides = [1, 1]} : vector<1x256xf32> to vector<1x128xf32>
    %23 = vector.extract_strided_slice %21 {offsets = [0, 128], sizes = [1, 128], strides = [1, 1]} : vector<1x256xf32> to vector<1x128xf32>
    %24 = math.tanh %23 : vector<1x128xf32>
    %c0_i32 = arith.constant 0 : i32
    %25 = vector.broadcast %c0_i32 : i32 to vector<8x128xi32>
    %26 = arith.cmpi eq, %16, %25 : vector<8x128xi32>
    %27 = vector.shape_cast %22 : vector<1x128xf32> to vector<1x128xf32>
    %28 = vector.broadcast %27 : vector<1x128xf32> to vector<8x128xf32>
    %29 = arith.select %26, %28, %17 : vector<8x128xi1>, vector<8x128xf32>
    %30 = tpu.concatenate %22, %24 in 1 : vector<1x128xf32>, vector<1x128xf32> -> vector<1x256xf32>
    %c0_19 = arith.constant 0 : index
    %c0_20 = arith.constant 0 : index
    %31 = vector.load %arg5[%c0_19, %c0_20] : memref<256x256xf32, #tpu.memory_space<vmem>>, vector<256x256xf32>
    %cst_21 = arith.constant dense<0.000000e+00> : vector<1x256xf32>
    %32 = tpu.matmul %30, %31, %cst_21 {dimension_numbers = #tpu.dot_dimension_numbers<[1], [0], [0], [1], [0, 0, 1, 1], [], []>} : vector<1x256xf32>, vector<256x256xf32>, vector<1x256xf32> -> vector<1x256xf32>
    %33 = vector.extract_strided_slice %8 {offsets = [1, 0], sizes = [1, 256], strides = [1, 1]} : vector<8x256xf32> to vector<1x256xf32>
    %34 = arith.addf %32, %33 : vector<1x256xf32>
    %35 = vector.extract_strided_slice %34 {offsets = [0, 0], sizes = [1, 128], strides = [1, 1]} : vector<1x256xf32> to vector<1x128xf32>
    %36 = vector.extract_strided_slice %34 {offsets = [0, 128], sizes = [1, 128], strides = [1, 1]} : vector<1x256xf32> to vector<1x128xf32>
    %37 = math.tanh %36 : vector<1x128xf32>
    %c1_i32 = arith.constant 1 : i32
    %38 = vector.broadcast %c1_i32 : i32 to vector<8x128xi32>
    %39 = arith.cmpi eq, %16, %38 : vector<8x128xi32>
    %40 = vector.shape_cast %35 : vector<1x128xf32> to vector<1x128xf32>
    %41 = vector.broadcast %40 : vector<1x128xf32> to vector<8x128xf32>
    %42 = arith.select %39, %41, %29 : vector<8x128xi1>, vector<8x128xf32>
    %43 = tpu.concatenate %35, %37 in 1 : vector<1x128xf32>, vector<1x128xf32> -> vector<1x256xf32>
    %c0_22 = arith.constant 0 : index
    %c0_23 = arith.constant 0 : index
    %44 = vector.load %arg5[%c0_22, %c0_23] : memref<256x256xf32, #tpu.memory_space<vmem>>, vector<256x256xf32>
    %cst_24 = arith.constant dense<0.000000e+00> : vector<1x256xf32>
    %45 = tpu.matmul %43, %44, %cst_24 {dimension_numbers = #tpu.dot_dimension_numbers<[1], [0], [0], [1], [0, 0, 1, 1], [], []>} : vector<1x256xf32>, vector<256x256xf32>, vector<1x256xf32> -> vector<1x256xf32>
    %46 = vector.extract_strided_slice %8 {offsets = [2, 0], sizes = [1, 256], strides = [1, 1]} : vector<8x256xf32> to vector<1x256xf32>
    %47 = arith.addf %45, %46 : vector<1x256xf32>
    %48 = vector.extract_strided_slice %47 {offsets = [0, 0], sizes = [1, 128], strides = [1, 1]} : vector<1x256xf32> to vector<1x128xf32>
    %49 = vector.extract_strided_slice %47 {offsets = [0, 128], sizes = [1, 128], strides = [1, 1]} : vector<1x256xf32> to vector<1x128xf32>
    %50 = math.tanh %49 : vector<1x128xf32>
    %c2_i32 = arith.constant 2 : i32
    %51 = vector.broadcast %c2_i32 : i32 to vector<8x128xi32>
    %52 = arith.cmpi eq, %16, %51 : vector<8x128xi32>
    %53 = vector.shape_cast %48 : vector<1x128xf32> to vector<1x128xf32>
    %54 = vector.broadcast %53 : vector<1x128xf32> to vector<8x128xf32>
    %55 = arith.select %52, %54, %42 : vector<8x128xi1>, vector<8x128xf32>
    %56 = tpu.concatenate %48, %50 in 1 : vector<1x128xf32>, vector<1x128xf32> -> vector<1x256xf32>
    %c0_25 = arith.constant 0 : index
    %c0_26 = arith.constant 0 : index
    %57 = vector.load %arg5[%c0_25, %c0_26] : memref<256x256xf32, #tpu.memory_space<vmem>>, vector<256x256xf32>
    %cst_27 = arith.constant dense<0.000000e+00> : vector<1x256xf32>
    %58 = tpu.matmul %56, %57, %cst_27 {dimension_numbers = #tpu.dot_dimension_numbers<[1], [0], [0], [1], [0, 0, 1, 1], [], []>} : vector<1x256xf32>, vector<256x256xf32>, vector<1x256xf32> -> vector<1x256xf32>
    %59 = vector.extract_strided_slice %8 {offsets = [3, 0], sizes = [1, 256], strides = [1, 1]} : vector<8x256xf32> to vector<1x256xf32>
    %60 = arith.addf %58, %59 : vector<1x256xf32>
    %61 = vector.extract_strided_slice %60 {offsets = [0, 0], sizes = [1, 128], strides = [1, 1]} : vector<1x256xf32> to vector<1x128xf32>
    %62 = vector.extract_strided_slice %60 {offsets = [0, 128], sizes = [1, 128], strides = [1, 1]} : vector<1x256xf32> to vector<1x128xf32>
    %63 = math.tanh %62 : vector<1x128xf32>
    %c3_i32 = arith.constant 3 : i32
    %64 = vector.broadcast %c3_i32 : i32 to vector<8x128xi32>
    %65 = arith.cmpi eq, %16, %64 : vector<8x128xi32>
    %66 = vector.shape_cast %61 : vector<1x128xf32> to vector<1x128xf32>
    %67 = vector.broadcast %66 : vector<1x128xf32> to vector<8x128xf32>
    %68 = arith.select %65, %67, %55 : vector<8x128xi1>, vector<8x128xf32>
    %69 = tpu.concatenate %61, %63 in 1 : vector<1x128xf32>, vector<1x128xf32> -> vector<1x256xf32>
    %c0_28 = arith.constant 0 : index
    %c0_29 = arith.constant 0 : index
    %70 = vector.load %arg5[%c0_28, %c0_29] : memref<256x256xf32, #tpu.memory_space<vmem>>, vector<256x256xf32>
    %cst_30 = arith.constant dense<0.000000e+00> : vector<1x256xf32>
    %71 = tpu.matmul %69, %70, %cst_30 {dimension_numbers = #tpu.dot_dimension_numbers<[1], [0], [0], [1], [0, 0, 1, 1], [], []>} : vector<1x256xf32>, vector<256x256xf32>, vector<1x256xf32> -> vector<1x256xf32>
    %72 = vector.extract_strided_slice %8 {offsets = [4, 0], sizes = [1, 256], strides = [1, 1]} : vector<8x256xf32> to vector<1x256xf32>
    %73 = arith.addf %71, %72 : vector<1x256xf32>
    %74 = vector.extract_strided_slice %73 {offsets = [0, 0], sizes = [1, 128], strides = [1, 1]} : vector<1x256xf32> to vector<1x128xf32>
    %75 = vector.extract_strided_slice %73 {offsets = [0, 128], sizes = [1, 128], strides = [1, 1]} : vector<1x256xf32> to vector<1x128xf32>
    %76 = math.tanh %75 : vector<1x128xf32>
    %c4_i32 = arith.constant 4 : i32
    %77 = vector.broadcast %c4_i32 : i32 to vector<8x128xi32>
    %78 = arith.cmpi eq, %16, %77 : vector<8x128xi32>
    %79 = vector.shape_cast %74 : vector<1x128xf32> to vector<1x128xf32>
    %80 = vector.broadcast %79 : vector<1x128xf32> to vector<8x128xf32>
    %81 = arith.select %78, %80, %68 : vector<8x128xi1>, vector<8x128xf32>
    %82 = tpu.concatenate %74, %76 in 1 : vector<1x128xf32>, vector<1x128xf32> -> vector<1x256xf32>
    %c0_31 = arith.constant 0 : index
    %c0_32 = arith.constant 0 : index
    %83 = vector.load %arg5[%c0_31, %c0_32] : memref<256x256xf32, #tpu.memory_space<vmem>>, vector<256x256xf32>
    %cst_33 = arith.constant dense<0.000000e+00> : vector<1x256xf32>
    %84 = tpu.matmul %82, %83, %cst_33 {dimension_numbers = #tpu.dot_dimension_numbers<[1], [0], [0], [1], [0, 0, 1, 1], [], []>} : vector<1x256xf32>, vector<256x256xf32>, vector<1x256xf32> -> vector<1x256xf32>
    %85 = vector.extract_strided_slice %8 {offsets = [5, 0], sizes = [1, 256], strides = [1, 1]} : vector<8x256xf32> to vector<1x256xf32>
    %86 = arith.addf %84, %85 : vector<1x256xf32>
    %87 = vector.extract_strided_slice %86 {offsets = [0, 0], sizes = [1, 128], strides = [1, 1]} : vector<1x256xf32> to vector<1x128xf32>
    %88 = vector.extract_strided_slice %86 {offsets = [0, 128], sizes = [1, 128], strides = [1, 1]} : vector<1x256xf32> to vector<1x128xf32>
    %89 = math.tanh %88 : vector<1x128xf32>
    %c5_i32 = arith.constant 5 : i32
    %90 = vector.broadcast %c5_i32 : i32 to vector<8x128xi32>
    %91 = arith.cmpi eq, %16, %90 : vector<8x128xi32>
    %92 = vector.shape_cast %87 : vector<1x128xf32> to vector<1x128xf32>
    %93 = vector.broadcast %92 : vector<1x128xf32> to vector<8x128xf32>
    %94 = arith.select %91, %93, %81 : vector<8x128xi1>, vector<8x128xf32>
    %95 = tpu.concatenate %87, %89 in 1 : vector<1x128xf32>, vector<1x128xf32> -> vector<1x256xf32>
    %c0_34 = arith.constant 0 : index
    %c0_35 = arith.constant 0 : index
    %96 = vector.load %arg5[%c0_34, %c0_35] : memref<256x256xf32, #tpu.memory_space<vmem>>, vector<256x256xf32>
    %cst_36 = arith.constant dense<0.000000e+00> : vector<1x256xf32>
    %97 = tpu.matmul %95, %96, %cst_36 {dimension_numbers = #tpu.dot_dimension_numbers<[1], [0], [0], [1], [0, 0, 1, 1], [], []>} : vector<1x256xf32>, vector<256x256xf32>, vector<1x256xf32> -> vector<1x256xf32>
    %98 = vector.extract_strided_slice %8 {offsets = [6, 0], sizes = [1, 256], strides = [1, 1]} : vector<8x256xf32> to vector<1x256xf32>
    %99 = arith.addf %97, %98 : vector<1x256xf32>
    %100 = vector.extract_strided_slice %99 {offsets = [0, 0], sizes = [1, 128], strides = [1, 1]} : vector<1x256xf32> to vector<1x128xf32>
    %101 = vector.extract_strided_slice %99 {offsets = [0, 128], sizes = [1, 128], strides = [1, 1]} : vector<1x256xf32> to vector<1x128xf32>
    %102 = math.tanh %101 : vector<1x128xf32>
    %c6_i32 = arith.constant 6 : i32
    %103 = vector.broadcast %c6_i32 : i32 to vector<8x128xi32>
    %104 = arith.cmpi eq, %16, %103 : vector<8x128xi32>
    %105 = vector.shape_cast %100 : vector<1x128xf32> to vector<1x128xf32>
    %106 = vector.broadcast %105 : vector<1x128xf32> to vector<8x128xf32>
    %107 = arith.select %104, %106, %94 : vector<8x128xi1>, vector<8x128xf32>
    %108 = tpu.concatenate %100, %102 in 1 : vector<1x128xf32>, vector<1x128xf32> -> vector<1x256xf32>
    %c0_37 = arith.constant 0 : index
    %c0_38 = arith.constant 0 : index
    %109 = vector.load %arg5[%c0_37, %c0_38] : memref<256x256xf32, #tpu.memory_space<vmem>>, vector<256x256xf32>
    %cst_39 = arith.constant dense<0.000000e+00> : vector<1x256xf32>
    %110 = tpu.matmul %108, %109, %cst_39 {dimension_numbers = #tpu.dot_dimension_numbers<[1], [0], [0], [1], [0, 0, 1, 1], [], []>} : vector<1x256xf32>, vector<256x256xf32>, vector<1x256xf32> -> vector<1x256xf32>
    %111 = vector.extract_strided_slice %8 {offsets = [7, 0], sizes = [1, 256], strides = [1, 1]} : vector<8x256xf32> to vector<1x256xf32>
    %112 = arith.addf %110, %111 : vector<1x256xf32>
    %113 = vector.extract_strided_slice %112 {offsets = [0, 0], sizes = [1, 128], strides = [1, 1]} : vector<1x256xf32> to vector<1x128xf32>
    %c7_i32 = arith.constant 7 : i32
    %114 = vector.broadcast %c7_i32 : i32 to vector<8x128xi32>
    %115 = arith.cmpi eq, %16, %114 : vector<8x128xi32>
    %116 = vector.shape_cast %113 : vector<1x128xf32> to vector<1x128xf32>
    %117 = vector.broadcast %116 : vector<1x128xf32> to vector<8x128xf32>
    %118 = arith.select %115, %117, %107 : vector<8x128xi1>, vector<8x128xf32>
    %c0_40 = arith.constant 0 : index
    %c0_41 = arith.constant 0 : index
    %119 = vector.load %arg6[%c0_40, %c0_41] : memref<8x128xf32, #tpu.memory_space<vmem>>, vector<8x128xf32>
    tpu.vector_store %arg6[%c0_40, %c0_41], %118 {strides = array<i32>} : memref<8x128xf32, #tpu.memory_space<vmem>>, vector<8x128xf32>,
    return
  }
}

</mosaic_0001>

<bundles_post_ra>
// kernel: tpu_custom_call.1
= control target key start
LH: loop header
LB: loop body
LE: loop exit
PB: predicated region body
PF: predicated region fallthrough
CT: control target
= control target key end

     0   :  { %11 = vsyncpa [#allocation3], 0  ;;  %s2516_s0 = inlined_call_operand.hbm [shape: f32[1,128], index: 0, kind: input, shape index: {}]   ;;  %s2517_s1 = inlined_call_operand.hbm [shape: f32[8,128], index: 1, kind: input, shape index: {}]   ;;  %s2518_s2 = inlined_call_operand.hbm [shape: f32[128,128], index: 2, kind: input, shape index: {}]   ;;  %s2519_s3 = inlined_call_operand.hbm [shape: f32[128,128], index: 3, kind: input, shape index: {}]   ;;  %s2520_s4 = inlined_call_operand.vmem [shape: f32[1,128], index: 4, kind: input, shape index: {}]   ;;  %s2521_s5 = inlined_call_operand.hbm [shape: f32[256,256], index: 5, kind: input, shape index: {}]   ;;  %s2522_s6 = inlined_call_operand.hbm [shape: f32[8,128], index: 6, kind: output, shape index: {}]  }
   0x1   :  { %12 = vsyncpa [#allocation6], 0 }
   0x2   :  { %13 = vsyncpa [#allocation9], 0 }
   0x3   :  { %14 = vsyncpa [#allocation4], 0  ;;  %s1983_s21 = smov [#allocation5]   ;;  %s1843_s25 = scalar_lea.hbm %s2517_s1, 128 }
   0x4   :  { %s31_s22 = sshll.u32 %s1983_s21, 4  ;;  %p1844_p0 = scmp.ne.s32.totalorder %s2517_s1, %s1843_s25  ;;  %s32_s22 = int_to_ptr.vmem [resolvable:$true] %s31_s22 }
   0x5   :  { %p1847_p1 = scmp.lt.u32.totalorder %s1843_s25, %s2517_s1 }
   0x7   :  { %p1849_p2 = pnand %p1847_p1, %p1844_p0 }
   0x9   :  { %1852 = shalt.err (!%p1849_p2)
}
   0xa   :  { %s1853_s30 = scalar_lea.vmem %s32_s22, 128  ;;  %p1858_p4 = scmp.lt.s32.totalorder %s32_s22, %s32_s22 }
   0xb   :  { %p1854_p3 = scmp.ne.s32.totalorder %s32_s22, %s1853_s30  ;;  %p1859_p5 = scmp.lt.s32.totalorder %s1853_s30, %s1853_s30 }
   0xd   :  { %p1860_p6 = por %p1859_p5, %p1858_p4 }
   0xf   :  { %p1861_p7 = pnand %p1860_p6, %p1854_p3 }
  0x11   :  { %1864 = shalt.err (!%p1861_p7)
}
  0x12   :  { %34 = dma.hbm_to_vmem [thread:$0]  %s2517_s1, 128, %s32_s22, [#allocation6]  }
  0x13   :  { %s1984_s9 = smov [#allocation8]   ;;  %s1985_s11 = smov [#allocation2]  }
  0x14   :  { %s52_s10 = sshll.u32 %s1984_s9, 4  ;;  %s21_s12 = sshll.u32 %s1985_s11, 4  ;;  %s53_s10 = int_to_ptr.vmem [resolvable:$true] %s52_s10  ;;  %s22_s12 = int_to_ptr.vmem [resolvable:$true] %s21_s12 }
  0x15   :  { %s1865_s15 = scalar_lea.hbm %s2519_s3, 2048 }
  0x16   :  { %p1866_p8 = scmp.ne.s32.totalorder %s2519_s3, %s1865_s15  ;;  %p1869_p9 = scmp.lt.u32.totalorder %s1865_s15, %s2519_s3 }
  0x18   :  { %p1871_p10 = pnand %p1869_p9, %p1866_p8 }
  0x1a   :  { %1874 = shalt.err (!%p1871_p10)
}
  0x1b   :  { %s1875_s1 = scalar_lea.vmem %s53_s10, 2048  ;;  %p1880_p12 = scmp.lt.s32.totalorder %s53_s10, %s53_s10 }
  0x1c   :  { %p1876_p11 = scmp.ne.s32.totalorder %s53_s10, %s1875_s1  ;;  %p1881_p13 = scmp.lt.s32.totalorder %s1875_s1, %s1875_s1 }
  0x1e   :  { %p1882_p0 = por %p1881_p13, %p1880_p12 }
  0x20   :  { %p1883_p1 = pnand %p1882_p0, %p1876_p11 }
  0x22   :  { %1886 = shalt.err (!%p1883_p1)
}
  0x23   :  { %s1986_s20 = smov 128   ;;  %s1987_s21 = smov 8  }
  0x24   :  { %58 = dma.hbm_to_vmem [thread:$0]  %s2519_s3, 2048, %s53_s10, [#allocation9], %s1986_s20, %s1986_s20, %s1987_s21  }
  0x25   :  { %s1887_s26 = scalar_lea.hbm %s2516_s0, 16 }
  0x26   :  { %p1888_p2 = scmp.ne.s32.totalorder %s2516_s0, %s1887_s26  ;;  %p1891_p3 = scmp.lt.u32.totalorder %s1887_s26, %s2516_s0 }
  0x28   :  { %p1893_p4 = pnand %p1891_p3, %p1888_p2 }
  0x2a   :  { %1896 = shalt.err (!%p1893_p4)
}
  0x2b   :  { %s1897_s7 = scalar_lea.vmem %s22_s12, 16  ;;  %s1901_s8 = scalar_lea.vmem %s22_s12, 32 }
  0x2c   :  { %p1898_p5 = scmp.ne.s32.totalorder %s22_s12, %s1897_s7  ;;  %p1902_p6 = scmp.lt.s32.totalorder %s22_s12, %s22_s12 }
  0x2d   :  { %p1903_p7 = scmp.lt.s32.totalorder %s1901_s8, %s1897_s7 }
  0x2f   :  { %p1904_p8 = por %p1903_p7, %p1902_p6 }
  0x31   :  { %p1905_p9 = pnand %p1904_p8, %p1898_p5 }
  0x33   :  { %1908 = shalt.err (!%p1905_p9)
}
  0x34   :  { %24 = dma.hbm_to_vmem [thread:$0]  %s2516_s0, 16, %s22_s12, [#allocation3]  }
  0x35   :  { %s1988_s10 = smov [#allocation7]   ;;  %s1989_s13 = smov [#allocation10]  }
  0x36   :  { %s40_s11 = sshll.u32 %s1988_s10, 4  ;;  %s66_s14 = sshll.u32 %s1989_s13, 4  ;;  %s41_s11 = int_to_ptr.vmem [resolvable:$true] %s40_s11  ;;  %s67_s14 = int_to_ptr.vmem [resolvable:$true] %s66_s14 }
  0x37   :  { %s1909_s17 = scalar_lea.hbm %s2518_s2, 2048 }
  0x38   :  { %p1910_p10 = scmp.ne.s32.totalorder %s2518_s2, %s1909_s17  ;;  %p1913_p11 = scmp.lt.u32.totalorder %s1909_s17, %s2518_s2 }
  0x3a   :  { %p1915_p12 = pnand %p1913_p11, %p1910_p10 }
  0x3c   :  { %1918 = shalt.err (!%p1915_p12)
}
  0x3d   :  { %s1919_s0 = scalar_lea.vmem %s41_s11, 2048  ;;  %p1924_p0 = scmp.lt.s32.totalorder %s41_s11, %s41_s11 }
  0x3e   :  { %p1920_p13 = scmp.ne.s32.totalorder %s41_s11, %s1919_s0  ;;  %p1925_p1 = scmp.lt.s32.totalorder %s1919_s0, %s1919_s0 }
  0x40   :  { %p1926_p2 = por %p1925_p1, %p1924_p0 }
  0x42   :  { %p1927_p3 = pnand %p1926_p2, %p1920_p13 }
  0x44   :  { %1930 = shalt.err (!%p1927_p3)
}
  0x45   :  { %46 = dma.hbm_to_vmem [thread:$0]  %s2518_s2, 2048, %s41_s11, [#allocation6], %s1986_s20, %s1986_s20, %s1987_s21  }
  0x46   :  { %s1931_s26 = scalar_lea.hbm %s2521_s5, 8192 }
  0x47   :  { %p1932_p4 = scmp.ne.s32.totalorder %s2521_s5, %s1931_s26  ;;  %p1935_p5 = scmp.lt.u32.totalorder %s1931_s26, %s2521_s5 }
  0x49   :  { %p1937_p6 = pnand %p1935_p5, %p1932_p4 }
  0x4b   :  { %1940 = shalt.err (!%p1937_p6)
}
  0x4c   :  { %s1941_s7 = scalar_lea.vmem %s67_s14, 8192  ;;  %p1946_p8 = scmp.lt.s32.totalorder %s67_s14, %s67_s14 }
  0x4d   :  { %p1942_p7 = scmp.ne.s32.totalorder %s67_s14, %s1941_s7  ;;  %p1947_p9 = scmp.lt.s32.totalorder %s1941_s7, %s1941_s7 }
  0x4f   :  { %p1948_p10 = por %p1947_p9, %p1946_p8 }
  0x51   :  { %p1949_p11 = pnand %p1948_p10, %p1942_p7 }
  0x53   :  { %1952 = shalt.err (!%p1949_p11)
}
  0x54   :  { %s1990_s2 = smov 256   ;;  %s1991_s20 = smov 16  }
  0x55   :  { %72 = dma.hbm_to_vmem [thread:$0]  %s2521_s5, 8192, %s67_s14, [#allocation9], %s1990_s2, %s1990_s2, %s1991_s20  }
  0x56   :  { %1975 = dma.done.wait [#allocation3], 16  }
  0x57   :  { %1976 = vsyncadd [#allocation3], 4294967280 }
  0x58   :  { %1977 = dma.done.wait [#allocation6], 2176  }
  0x59   :  { %1978 = vsyncadd [#allocation6], 4294965120 }
  0x5a   :  { %1979 = dma.done.wait [#allocation9], 10240  }
  0x5b   :  { %1980 = vsyncadd [#allocation9], 4294957056  ;;  %v1992_v0 = vmov 0.0|0.0   ;;  %vm1993_vm0 = vmmov 0   ;;  %v1994_v1 = vmov 0.0   ;;  %v89_v2 = vld [vmem:[#allocation7] sm:$0xff] }
  0x5c   :  { %1230 = vmatprep.subr.bf16.mxu0 %v1992_v0  ;;  %1157 = vmatprep.mubr.msk.f32.mxu0 %vm1993_vm0, %v1994_v1  ;;  %v90_v3 = vld [vmem:[#allocation7 + $0x8] sm:$0xff]  ;;  %v91_v4 = vld [vmem:[#allocation7 + $0x10] sm:$0xff]  ;;  %v92_v6 = vld [vmem:[#allocation7 + $0x18] sm:$0xff] }
  0x5d   :  { %1254 = vmatprep.subr.bf16.mxu1 %v1992_v0  ;;  %1192 = vmatprep.mubr.msk.f32.mxu1 %vm1993_vm0, %v1994_v1  ;;  %v1231_v5 = vpack.c.bf16 %v90_v3, %v89_v2  ;;  %v1234_v7 = vpack.c.bf16 %v92_v6, %v91_v4  ;;  %v93_v8 = vld [vmem:[#allocation7 + $0x20] sm:$0xff]  ;;  %v94_v9 = vld [vmem:[#allocation7 + $0x28] sm:$0xff]  ;;  %v95_v13 = vld [vmem:[#allocation7 + $0x30] sm:$0xff] }
  0x5e   :  { %v175_v10 = vld [vmem:[#allocation8] sm:$0xff]  ;;  %v176_v11 = vld [vmem:[#allocation8 + $0x8] sm:$0xff]  ;;  %v1237_v12 = vpack.c.bf16 %v94_v9, %v93_v8  ;;  %v96_v15 = vld [vmem:[#allocation7 + $0x38] sm:$0xff] }
  0x5f   :  { %1232 = vmatpush3.bf16.msra.mxu0 %v1231_v5  ;;  %v2104_v14 = vpack.c.bf16 %v176_v11, %v175_v10  ;;  %v177_v16 = vld [vmem:[#allocation8 + $0x10] sm:$0xff]  ;;  %v178_v17 = vld [vmem:[#allocation8 + $0x18] sm:$0xff]  ;;  %v1240_v18 = vpack.c.bf16 %v96_v15, %v95_v13  ;;  %v97_v19 = vld [vmem:[#allocation7 + $0x40] sm:$0xff] }
  0x60   :  { %1233 = vmatprep.subr.bf16.mxu0 %v1992_v0  ;;  %v1258_v20 = vpack.c.bf16 %v178_v17, %v177_v16  ;;  %v98_v21 = vld [vmem:[#allocation7 + $0x48] sm:$0xff]  ;;  %v179_v22 = vld [vmem:[#allocation8 + $0x20] sm:$0xff]  ;;  %v99_v25 = vld [vmem:[#allocation7 + $0x50] sm:$0xff] }
  0x61   :  { %1256 = vmatpush3.bf16.msra.mxu1 %v2104_v14  ;;  %v180_v23 = vld [vmem:[#allocation8 + $0x28] sm:$0xff]  ;;  %v1243_v24 = vpack.c.bf16 %v98_v21, %v97_v19  ;;  %v100_v27 = vld [vmem:[#allocation7 + $0x58] sm:$0xff]  ;;  %v181_v28 = vld [vmem:[#allocation8 + $0x30] sm:$0xff] }
  0x62   :  { %1257 = vmatprep.subr.bf16.mxu1 %v1992_v0  ;;  %v1261_v26 = vpack.c.bf16 %v180_v23, %v179_v22  ;;  %v182_v29 = vld [vmem:[#allocation8 + $0x38] sm:$0xff]  ;;  %v1246_v30 = vpack.c.bf16 %v100_v27, %v99_v25  ;;  %v101_v31 = vld [vmem:[#allocation7 + $0x60] sm:$0xff]  ;;  %v102_v33 = vld [vmem:[#allocation7 + $0x68] sm:$0xff] }
  0x63   :  { %1235 = vmatpush3.bf16.msra.mxu0 %v1234_v7  ;;  %v1264_v32 = vpack.c.bf16 %v182_v29, %v181_v28  ;;  %v183_v34 = vld [vmem:[#allocation8 + $0x40] sm:$0xff]  ;;  %v184_v35 = vld [vmem:[#allocation8 + $0x48] sm:$0xff]  ;;  %v1249_v36 = vpack.c.bf16 %v102_v33, %v101_v31  ;;  %v103_v37 = vld [vmem:[#allocation7 + $0x70] sm:$0xff] }
  0x64   :  { %1236 = vmatprep.subr.bf16.mxu0 %v1992_v0  ;;  %v1267_v38 = vpack.c.bf16 %v184_v35, %v183_v34  ;;  %v104_v39 = vld [vmem:[#allocation7 + $0x78] sm:$0xff]  ;;  %v185_v40 = vld [vmem:[#allocation8 + $0x50] sm:$0xff]  ;;  %v187_v44 = vld [vmem:[#allocation8 + $0x60] sm:$0xff] }
  0x65   :  { %1259 = vmatpush3.bf16.msra.mxu1 %v1258_v20  ;;  %v186_v41 = vld [vmem:[#allocation8 + $0x58] sm:$0xff]  ;;  %v1252_v42 = vpack.c.bf16 %v104_v39, %v103_v37  ;;  %v188_v45 = vld [vmem:[#allocation8 + $0x68] sm:$0xff]  ;;  %v189_v48 = vld [vmem:[#allocation8 + $0x70] sm:$0xff] }
  0x66   :  { %1260 = vmatprep.subr.bf16.mxu1 %v1992_v0  ;;  %v1270_v43 = vpack.c.bf16 %v186_v41, %v185_v40  ;;  %v88_v46 = vld [vmem:[#allocation5] sm:$0xff]  ;;  %v1273_v47 = vpack.c.bf16 %v188_v45, %v187_v44  ;;  %v2131_v51 = vld [vmem:[#allocation2] sm:$0x1]  ;;  %v343_v52 = vld [vmem:[#allocation10 + $0x8] sm:$0xff] }
  0x67   :  { %1238 = vmatpush3.bf16.msra.mxu0 %v1237_v12  ;;  %v190_v49 = vld [vmem:[#allocation8 + $0x78] sm:$0xff]  ;;  %v342_v55 = vld [vmem:[#allocation10] sm:$0xff]  ;;  %v344_v56 = vld [vmem:[#allocation10 + $0x10] sm:$0xff] }
  0x68   :  { %1239 = vmatprep.subr.bf16.mxu0 %v1992_v0  ;;  %v1276_v50 = vpack.c.bf16 %v190_v49, %v189_v48  ;;  %v345_v53 = vld [vmem:[#allocation10 + $0x18] sm:$0xff]  ;;  %v2136_v57 = vpack.c.bf16 %v344_v56, %v342_v55  ;;  %v347_v58 = vld [vmem:[#allocation10 + $0x28] sm:$0xff]  ;;  %v346_v61 = vld [vmem:[#allocation10 + $0x20] sm:$0xff] }
  0x69   :  { %1262 = vmatpush3.bf16.msra.mxu1 %v1261_v26  ;;  %v2134_v54 = vpack.c.bf16 %v345_v53, %v343_v52  ;;  %v349_v59 = vld [vmem:[#allocation10 + $0x38] sm:$0xff]  ;;  %v348_v62 = vld [vmem:[#allocation10 + $0x30] sm:$0xff]  ;;  %v350_v3 = vld [vmem:[#allocation10 + $0x40] sm:$0xff] }
  0x6a   :  { %1263 = vmatprep.subr.bf16.mxu1 %v1992_v0  ;;  %v2141_v60 = vpack.c.bf16 %v349_v59, %v347_v58  ;;  %v2143_v63 = vpack.c.bf16 %v348_v62, %v346_v61  ;;  %v352_v4 = vld [vmem:[#allocation10 + $0x50] sm:$0xff]  ;;  %v355_v6 = vld [vmem:[#allocation10 + $0x68] sm:$0xff]  ;;  %v357_v7 = vld [vmem:[#allocation10 + $0x78] sm:$0xff] }
  0x6b   :  { %1241 = vmatpush3.bf16.msra.mxu0 %v1240_v18  ;;  %v2149_v5 = vpack.c.bf16 %v352_v4, %v350_v3  ;;  %v2153_v8 = vpack.c.bf16 %v357_v7, %v355_v6  ;;  %v354_v9 = vld [vmem:[#allocation10 + $0x60] sm:$0xff]  ;;  %v356_v10 = vld [vmem:[#allocation10 + $0x70] sm:$0xff]  ;;  %v359_v12 = vld [vmem:[#allocation10 + $0x88] sm:$0xff] }
  0x6c   :  { %1242 = vmatprep.subr.bf16.mxu0 %v1992_v0  ;;  %v2155_v11 = vpack.c.bf16 %v356_v10, %v354_v9  ;;  %v361_v13 = vld [vmem:[#allocation10 + $0x98] sm:$0xff]  ;;  %v358_v15 = vld [vmem:[#allocation10 + $0x80] sm:$0xff]  ;;  %v360_v16 = vld [vmem:[#allocation10 + $0x90] sm:$0xff] }
  0x6d   :  { %1265 = vmatpush3.bf16.msra.mxu1 %v1264_v32  ;;  %v2161_v17 = vpack.c.bf16 %v360_v16, %v358_v15  ;;  %v363_v18 = vld [vmem:[#allocation10 + $0xa8] sm:$0xff]  ;;  %v365_v19 = vld [vmem:[#allocation10 + $0xb8] sm:$0xff]  ;;  %v362_v21 = vld [vmem:[#allocation10 + $0xa0] sm:$0xff] }
  0x6e   :  { %1266 = vmatprep.subr.bf16.mxu1 %v1992_v0  ;;  %v364_v22 = vld [vmem:[#allocation10 + $0xb0] sm:$0xff]  ;;  %v369_v25 = vld [vmem:[#allocation10 + $0xd8] sm:$0xff]  ;;  %v366_v27 = vld [vmem:[#allocation10 + $0xc0] sm:$0xff] }
  0x6f   :  { %1244 = vmatpush3.bf16.msra.mxu0 %v1243_v24  ;;  %v2167_v23 = vpack.c.bf16 %v364_v22, %v362_v21  ;;  %v367_v24 = vld [vmem:[#allocation10 + $0xc8] sm:$0xff]  ;;  %v368_v28 = vld [vmem:[#allocation10 + $0xd0] sm:$0xff]  ;;  %v373_v31 = vld [vmem:[#allocation10 + $0xf8] sm:$0xff] }
  0x70   :  { %1245 = vmatprep.subr.bf16.mxu0 %v1992_v0  ;;  %v2173_v29 = vpack.c.bf16 %v368_v28, %v366_v27  ;;  %v370_v33 = vld [vmem:[#allocation10 + $0xe0] sm:$0xff]  ;;  %v372_v34 = vld [vmem:[#allocation10 + $0xf0] sm:$0xff]  ;;  %v377_v37 = vld [vmem:[#allocation10 + $0x118] sm:$0xff] }
  0x71   :  { %1268 = vmatpush3.bf16.msra.mxu1 %v1267_v38  ;;  %v2179_v35 = vpack.c.bf16 %v372_v34, %v370_v33  ;;  %v374_v39 = vld [vmem:[#allocation10 + $0x100] sm:$0xff]  ;;  %v376_v40 = vld [vmem:[#allocation10 + $0x110] sm:$0xff]  ;;  %v383_v48 = vld [vmem:[#allocation10 + $0x148] sm:$0xff] }
  0x72   :  { %1269 = vmatprep.subr.bf16.mxu1 %v1992_v0  ;;  %v2185_v41 = vpack.c.bf16 %v376_v40, %v374_v39  ;;  %v378_v45 = vld [vmem:[#allocation10 + $0x120] sm:$0xff]  ;;  %v385_v49 = vld [vmem:[#allocation10 + $0x158] sm:$0xff]  ;;  %v384_v53 = vld [vmem:[#allocation10 + $0x150] sm:$0xff] }
  0x73   :  { %1247 = vmatpush3.bf16.msra.mxu0 %v1246_v30  ;;  %v371_v30 = vld [vmem:[#allocation10 + $0xe8] sm:$0xff]  ;;  %v382_v52 = vld [vmem:[#allocation10 + $0x140] sm:$0xff]  ;;  %v389_v58 = vld [vmem:[#allocation10 + $0x178] sm:$0xff] }
  0x74   :  { %1248 = vmatprep.subr.bf16.mxu0 %v1992_v0  ;;  %v2197_v55 = vpack.c.bf16 %v384_v53, %v382_v52  ;;  %v387_v56 = vld [vmem:[#allocation10 + $0x168] sm:$0xff]  ;;  %v386_v61 = vld [vmem:[#allocation10 + $0x160] sm:$0xff]  ;;  %v388_v62 = vld [vmem:[#allocation10 + $0x170] sm:$0xff] }
  0x75   :  { %1271 = vmatpush3.bf16.msra.mxu1 %v1270_v43  ;;  %v2201_v59 = vpack.c.bf16 %v389_v58, %v387_v56  ;;  %v393_v3 = vld [vmem:[#allocation10 + $0x198] sm:$0xff]  ;;  %v390_v6 = vld [vmem:[#allocation10 + $0x180] sm:$0xff]  ;;  %v392_v7 = vld [vmem:[#allocation10 + $0x190] sm:$0xff] }
  0x76   :  { %1272 = vmatprep.subr.bf16.mxu1 %v1992_v0  ;;  %v2209_v9 = vpack.c.bf16 %v392_v7, %v390_v6  ;;  %v395_v10 = vld [vmem:[#allocation10 + $0x1a8] sm:$0xff]  ;;  %v394_v15 = vld [vmem:[#allocation10 + $0x1a0] sm:$0xff]  ;;  %v396_v16 = vld [vmem:[#allocation10 + $0x1b0] sm:$0xff] }
  0x77   :  { %1250 = vmatpush3.bf16.msra.mxu0 %v1249_v36  ;;  %v375_v36 = vld [vmem:[#allocation10 + $0x108] sm:$0xff]  ;;  %v401_v21 = vld [vmem:[#allocation10 + $0x1d8] sm:$0xff]  ;;  %v402_v33 = vld [vmem:[#allocation10 + $0x1e0] sm:$0xff] }
  0x78   :  { %1251 = vmatprep.subr.bf16.mxu0 %v1992_v0  ;;  %v403_v28 = vld [vmem:[#allocation10 + $0x1e8] sm:$0xff]  ;;  %v404_v34 = vld [vmem:[#allocation10 + $0x1f0] sm:$0xff] }
  0x79   :  { %1274 = vmatpush3.bf16.msra.mxu1 %v1273_v47  ;;  %v2253_v40 = vld [vmem:[%s2520_s4] sm:$0x1]  ;;  %s1995_s4 = smov [#allocation11]  }
  0x7a   :  { %1275 = vmatprep.subr.bf16.mxu1 %v1992_v0  ;;  %s1063_s9 = sshll.u32 %s1995_s4, 4  ;;  %s1064_s9 = int_to_ptr.vmem [resolvable:$true] %s1063_s9 }
  0x7b   :  { %1253 = vmatpush3.bf16.msra.mxu0 %v1252_v42  ;;  %v379_v42 = vld [vmem:[#allocation10 + $0x128] sm:$0xff]  ;;  %s1953_s10 = scalar_lea.vmem %s1064_s9, 128  ;;  %p1958_p13 = scmp.lt.s32.totalorder %s1064_s9, %s1064_s9 }
  0x7c   :  { %1278 = vmatprep.subr.bf16.mxu0 %v1992_v0  ;;  %p1954_p12 = scmp.ne.s32.totalorder %s1064_s9, %s1953_s10  ;;  %p1959_p0 = scmp.lt.s32.totalorder %s1953_s10, %s1953_s10 }
  0x7d   :  { %1277 = vmatpush3.bf16.msra.mxu1 %v1276_v50 }
  0x7e   :  { %1158 = vmatmul.mubr.f32.vlgmr.msra.gmra.mrb[0].mxu0 %v88_v46  ;;  %1303 = vmatprep.subr.bf16.mxu1 %v2134_v54  ;;  %v380_v46 = vld [vmem:[#allocation10 + $0x130] sm:$0xff]  ;;  %p1960_p1 = por %p1959_p0, %p1958_p13 }
  0x7f   :  { %1280 = vmatpush3.bf16.msra.mxu0 %v2104_v14  ;;  %1227 = vmatprep.mubr.msk.f32.mxu0 %vm1993_vm0, %v1994_v1  ;;  %v353_v1 = vld [vmem:[#allocation10 + $0x58] sm:$0xff]  ;;  %v2159_v14 = vpack.c.bf16 %v361_v13, %v359_v12 }
  0x80   :  { %1281 = vmatprep.subr.bf16.mxu0 %v1992_v0  ;;  %v397_v12 = vld [vmem:[#allocation10 + $0x1b8] sm:$0xff]  ;;  %p1961_p2 = pnand %p1960_p1, %p1954_p12 }
  0x81   :  { %v2213_v13 = vpack.c.bf16 %v397_v12, %v395_v10 }
  0x83   :  { %1283 = vmatpush3.bf16.msra.mxu0 %v1258_v20  ;;  %v2165_v20 = vpack.c.bf16 %v365_v19, %v363_v18  ;;  %v2215_v18 = vpack.c.bf16 %v396_v16, %v394_v15  ;;  %v399_v19 = vld [vmem:[#allocation10 + $0x1c8] sm:$0xff] }
  0x84   :  { %1284 = vmatprep.subr.bf16.mxu0 %v1992_v0  ;;  %v2219_v22 = vpack.c.bf16 %v401_v21, %v399_v19 }
  0x87   :  { %1286 = vmatpush3.bf16.msra.mxu0 %v1261_v26  ;;  %v2171_v26 = vpack.c.bf16 %v369_v25, %v367_v24  ;;  %v398_v24 = vld [vmem:[#allocation10 + $0x1c0] sm:$0xff]  ;;  %v400_v25 = vld [vmem:[#allocation10 + $0x1d0] sm:$0xff] }
  0x88   :  { %1287 = vmatprep.subr.bf16.mxu0 %v1992_v0  ;;  %v2221_v27 = vpack.c.bf16 %v400_v25, %v398_v24 }
  0x8b   :  { %1289 = vmatpush3.bf16.msra.mxu0 %v1264_v32  ;;  %v2177_v32 = vpack.c.bf16 %v373_v31, %v371_v30  ;;  %v405_v30 = vld [vmem:[#allocation10 + $0x1f8] sm:$0xff] }
  0x8c   :  { %1290 = vmatprep.subr.bf16.mxu0 %v1992_v0  ;;  %v2225_v31 = vpack.c.bf16 %v405_v30, %v403_v28 }
  0x8f   :  { %1292 = vmatpush3.bf16.msra.mxu0 %v1267_v38  ;;  %v2183_v38 = vpack.c.bf16 %v377_v37, %v375_v36  ;;  %v2227_v36 = vpack.c.bf16 %v404_v34, %v402_v33 }
  0x90   :  { %1293 = vmatprep.subr.bf16.mxu0 %v1992_v0 }
  0x93   :  { %1295 = vmatpush3.bf16.msra.mxu0 %v1270_v43  ;;  %v381_v43 = vld [vmem:[#allocation10 + $0x138] sm:$0xff] }
  0x94   :  { %1296 = vmatprep.subr.bf16.mxu0 %v1992_v0  ;;  %v2189_v44 = vpack.c.bf16 %v381_v43, %v379_v42 }
  0x97   :  { %1298 = vmatpush3.bf16.msra.mxu0 %v1273_v47  ;;  %v2191_v47 = vpack.c.bf16 %v380_v46, %v378_v45 }
  0x98   :  { %1299 = vmatprep.subr.bf16.mxu0 %v1992_v0  ;;  %v351_v0 = vld [vmem:[#allocation10 + $0x48] sm:$0xff] }
  0x99   :  { %v2147_v2 = vpack.c.bf16 %v353_v1, %v351_v0  ;;  %v2203_v0 = vpack.c.bf16 %v388_v62, %v386_v61  ;;  %v391_v1 = vld [vmem:[#allocation10 + $0x188] sm:$0xff] }
  0x9a   :  { %v2207_v4 = vpack.c.bf16 %v393_v3, %v391_v1 }
  0x9b   :  { %1301 = vmatpush3.bf16.msra.mxu0 %v1276_v50  ;;  %v2195_v50 = vpack.c.bf16 %v385_v49, %v383_v48  ;;  %v193_v49 = vlaneseq }
  0x9c   :  { %1367 = vmatprep.subr.bf16.mxu0 %v2134_v54 }
  0x9d   :  { %v2306_v52 = vshrl.u32 %v193_v49, 7 }
  0x9e   :  { %1228 = vmatmul.mubr.f32.vlgmr.msra.gmra.mrb[2].mxu0 %v2131_v51 }
  0x9f   :  { %1369 = vmatpush1.bf16.msra.mxu0 %v2136_v57  ;;  %v2309_v53 = vsub.s32 0, %v2306_v52  ;;  %vm478_vm1 = vcmp.eq.s32.totalorder %v2306_v52, 0  ;;  %vm562_vm2 = vcmp.eq.s32.totalorder %v2306_v52, 1  ;;  %vm644_vm3 = vcmp.eq.s32.totalorder %v2306_v52, 2 }
  0xa0   :  { %1371 = vmatprep.subr.bf16.mxu0 %v2141_v60  ;;  %vm726_vm4 = vcmp.eq.s32.totalorder %v2306_v52, 3  ;;  %vm808_vm5 = vcmp.eq.s32.totalorder %v2306_v52, 4  ;;  %vm890_vm6 = vcmp.eq.s32.totalorder %v2306_v52, 5  ;;  %vm972_vm7 = vcmp.eq.s32.totalorder %v2306_v52, 6 }
  0xa1   :  { %v196_v56 = vrot.slane %v2253_v40, %v2309_v53  ;;  %vm1050_vm8 = vcmp.eq.s32.totalorder %v2306_v52, 7 }
  0xa3   :  { %1373 = vmatpush1.bf16.msra.mxu0 %v2143_v63 }
  0xa4   :  { %1375 = vmatprep.subr.bf16.mxu0 %v2147_v2 }
  0xa7   :  { %1377 = vmatpush1.bf16.msra.mxu0 %v2149_v5 }
  0xa8   :  { %1379 = vmatprep.subr.bf16.mxu0 %v2153_v8 }
  0xab   :  { %1381 = vmatpush1.bf16.msra.mxu0 %v2155_v11 }
  0xac   :  { %1383 = vmatprep.subr.bf16.mxu0 %v2159_v14 }
  0xaf   :  { %1385 = vmatpush1.bf16.msra.mxu0 %v2161_v17 }
  0xb0   :  { %1387 = vmatprep.subr.bf16.mxu0 %v2165_v20 }
  0xb3   :  { %1389 = vmatpush1.bf16.msra.mxu0 %v2167_v23 }
  0xb4   :  { %1391 = vmatprep.subr.bf16.mxu0 %v2171_v26 }
  0xb7   :  { %1393 = vmatpush1.bf16.msra.mxu0 %v2173_v29 }
  0xb8   :  { %1395 = vmatprep.subr.bf16.mxu0 %v2177_v32 }
  0xbb   :  { %1397 = vmatpush1.bf16.msra.mxu0 %v2179_v35 }
  0xbc   :  { %1399 = vmatprep.subr.bf16.mxu0 %v2183_v38 }
  0xbf   :  { %1401 = vmatpush1.bf16.msra.mxu0 %v2185_v41 }
  0xc0   :  { %1403 = vmatprep.subr.bf16.mxu0 %v2189_v44 }
  0xc3   :  { %1405 = vmatpush1.bf16.msra.mxu0 %v2191_v47 }
  0xc4   :  { %1407 = vmatprep.subr.bf16.mxu0 %v2195_v50 }
  0xc7   :  { %1409 = vmatpush1.bf16.msra.mxu0 %v2197_v55 }
  0xc8   :  { %1411 = vmatprep.subr.bf16.mxu0 %v2201_v59 }
  0xcb   :  { %1413 = vmatpush1.bf16.msra.mxu0 %v2203_v0 }
  0xcc   :  { %1415 = vmatprep.subr.bf16.mxu0 %v2207_v4 }
  0xcf   :  { %1417 = vmatpush1.bf16.msra.mxu0 %v2209_v9 }
  0xd0   :  { %1419 = vmatprep.subr.bf16.mxu0 %v2213_v13 }
  0xd3   :  { %1421 = vmatpush1.bf16.msra.mxu0 %v2215_v18 }
  0xd4   :  { %1423 = vmatprep.subr.bf16.mxu0 %v2219_v22 }
  0xd7   :  { %1425 = vmatpush1.bf16.msra.mxu0 %v2221_v27 }
  0xd8   :  { %1427 = vmatprep.subr.bf16.mxu0 %v2225_v31 }
  0xdb   :  { %1429 = vmatpush1.bf16.msra.mxu0 %v2227_v36 }
  0xdc   :  { %1495 = vmatprep.subr.bf16.mxu0 %v2134_v54 }
 0x151   :  { %v2232_v37 = vpop.f32.mrb[0].mxu0 }
 0x152   :  { %v1159_v39 = vpop.f32.mrb[1].mxu0  ;;  %1193 = vmatmul.mubr.f32.vlgmr.msra.gmra.mrb[0].mxu1 %v2232_v37  ;;  %v486_v7 = vrot.slane %v2232_v37, 1  ;;  %v568_v33 = vrot.slane %v2232_v37, 2 }
 0x153   :  { %1305 = vmatpush1.bf16.msra.mxu1 %v2136_v57 }
 0x154   :  { %1307 = vmatprep.subr.bf16.mxu1 %v2141_v60 }
 0x157   :  { %1309 = vmatpush1.bf16.msra.mxu1 %v2143_v63 }
 0x158   :  { %1311 = vmatprep.subr.bf16.mxu1 %v2147_v2 }
 0x15b   :  { %1313 = vmatpush1.bf16.msra.mxu1 %v2149_v5 }
 0x15c   :  { %1315 = vmatprep.subr.bf16.mxu1 %v2153_v8 }
 0x15f   :  { %1317 = vmatpush1.bf16.msra.mxu1 %v2155_v11 }
 0x160   :  { %1319 = vmatprep.subr.bf16.mxu1 %v2159_v14 }
 0x163   :  { %1321 = vmatpush1.bf16.msra.mxu1 %v2161_v17 }
 0x164   :  { %1323 = vmatprep.subr.bf16.mxu1 %v2165_v20 }
 0x167   :  { %1325 = vmatpush1.bf16.msra.mxu1 %v2167_v23 }
 0x168   :  { %1327 = vmatprep.subr.bf16.mxu1 %v2171_v26 }
 0x16b   :  { %1329 = vmatpush1.bf16.msra.mxu1 %v2173_v29 }
 0x16c   :  { %1331 = vmatprep.subr.bf16.mxu1 %v2177_v32 }
 0x16f   :  { %1333 = vmatpush1.bf16.msra.mxu1 %v2179_v35 }
 0x170   :  { %1335 = vmatprep.subr.bf16.mxu1 %v2183_v38 }
 0x171   :  { %v335_v42 = vpop.f32.mrb[2].mxu0 }
 0x172   :  { %v336_v43 = vadd.f32 %v335_v42, %v2253_v40  ;;  %v1229_v45 = vpop.f32.mrb[3].mxu0 }
 0x173   :  { %1337 = vmatpush1.bf16.msra.mxu1 %v2185_v41 }
 0x174   :  { %1339 = vmatprep.subr.bf16.mxu1 %v2189_v44  ;;  %1827 = vtanh.f32 %v336_v43 }
 0x177   :  { %1341 = vmatpush1.bf16.msra.mxu1 %v2191_v47 }
 0x178   :  { %1343 = vmatprep.subr.bf16.mxu1 %v2195_v50 }
 0x17b   :  { %1345 = vmatpush1.bf16.msra.mxu1 %v2197_v55 }
 0x17c   :  { %1347 = vmatprep.subr.bf16.mxu1 %v2201_v59 }
 0x17e   :  { %v1828_v46 = vpop.eup %1827 }
 0x17f   :  { %1349 = vmatpush1.bf16.msra.mxu1 %v2203_v0  ;;  %470 = vmatprep.mubr.f32.mxu1 %v1828_v46 }
 0x180   :  { %1351 = vmatprep.subr.bf16.mxu1 %v2207_v4 }
 0x183   :  { %1353 = vmatpush1.bf16.msra.mxu1 %v2209_v9 }
 0x184   :  { %1355 = vmatprep.subr.bf16.mxu1 %v2213_v13 }
 0x187   :  { %1357 = vmatpush1.bf16.msra.mxu1 %v2215_v18 }
 0x188   :  { %1359 = vmatprep.subr.bf16.mxu1 %v2219_v22 }
 0x18b   :  { %1361 = vmatpush1.bf16.msra.mxu1 %v2221_v27 }
 0x18c   :  { %1363 = vmatprep.subr.bf16.mxu1 %v2225_v31 }
 0x18f   :  { %1365 = vmatpush1.bf16.msra.mxu1 %v2227_v36 }
 0x190   :  { %1431 = vmatprep.subr.bf16.mxu1 %v2134_v54 }
 0x192   :  { %471 = vmatmul.mubr.f32.vlgmr.msra.gmra.mrb[2].mxu1 %v2131_v51 }
 0x193   :  { %1433 = vmatpush1.bf16.msra.mxu1 %v2136_v57 }
 0x194   :  { %1435 = vmatprep.subr.bf16.mxu1 %v2141_v60 }
 0x197   :  { %1437 = vmatpush1.bf16.msra.mxu1 %v2143_v63 }
 0x198   :  { %1439 = vmatprep.subr.bf16.mxu1 %v2147_v2 }
 0x19b   :  { %1441 = vmatpush1.bf16.msra.mxu1 %v2149_v5 }
 0x19c   :  { %1443 = vmatprep.subr.bf16.mxu1 %v2153_v8 }
 0x19f   :  { %1445 = vmatpush1.bf16.msra.mxu1 %v2155_v11 }
 0x1a0   :  { %1447 = vmatprep.subr.bf16.mxu1 %v2159_v14 }
 0x1a3   :  { %1449 = vmatpush1.bf16.msra.mxu1 %v2161_v17 }
 0x1a4   :  { %1451 = vmatprep.subr.bf16.mxu1 %v2165_v20 }
 0x1a7   :  { %1453 = vmatpush1.bf16.msra.mxu1 %v2167_v23 }
 0x1a8   :  { %1455 = vmatprep.subr.bf16.mxu1 %v2171_v26 }
 0x1ab   :  { %1457 = vmatpush1.bf16.msra.mxu1 %v2173_v29 }
 0x1ac   :  { %1459 = vmatprep.subr.bf16.mxu1 %v2177_v32 }
 0x1af   :  { %1461 = vmatpush1.bf16.msra.mxu1 %v2179_v35 }
 0x1b0   :  { %1463 = vmatprep.subr.bf16.mxu1 %v2183_v38 }
 0x1b3   :  { %1465 = vmatpush1.bf16.msra.mxu1 %v2185_v41 }
 0x1b4   :  { %1467 = vmatprep.subr.bf16.mxu1 %v2189_v44 }
 0x1b7   :  { %1469 = vmatpush1.bf16.msra.mxu1 %v2191_v47 }
 0x1b8   :  { %1471 = vmatprep.subr.bf16.mxu1 %v2195_v50 }
 0x1bb   :  { %1473 = vmatpush1.bf16.msra.mxu1 %v2197_v55 }
 0x1bc   :  { %1475 = vmatprep.subr.bf16.mxu1 %v2201_v59 }
 0x1bf   :  { %1477 = vmatpush1.bf16.msra.mxu1 %v2203_v0 }
 0x1c0   :  { %1479 = vmatprep.subr.bf16.mxu1 %v2207_v4 }
 0x1c3   :  { %1481 = vmatpush1.bf16.msra.mxu1 %v2209_v9 }
 0x1c4   :  { %1483 = vmatprep.subr.bf16.mxu1 %v2213_v13 }
 0x1c7   :  { %1485 = vmatpush1.bf16.msra.mxu1 %v2215_v18 }
 0x1c8   :  { %1487 = vmatprep.subr.bf16.mxu1 %v2219_v22 }
 0x1cb   :  { %1489 = vmatpush1.bf16.msra.mxu1 %v2221_v27 }
 0x1cc   :  { %1491 = vmatprep.subr.bf16.mxu1 %v2225_v31 }
 0x1cf   :  { %1493 = vmatpush1.bf16.msra.mxu1 %v2227_v36 }
 0x1d0   :  { %1559 = vmatprep.subr.bf16.mxu1 %v2134_v54 }
 0x225   :  { %v264_v51 = vpop.f32.mrb[0].mxu1 }
 0x226   :  { %v1194_v48 = vpop.f32.mrb[1].mxu1  ;;  %v2313_v58 = vadd.f32 %v264_v51, %v196_v56 }
 0x227   :  { %v650_v48 = vrot.slane %v2232_v37, 3 }
 0x228   :  { %v487_v15 = vrot.slane %v2313_v58, 1  ;;  %v569_v39 = vrot.slane %v2313_v58, 2  ;;  %v651_v56 = vrot.slane %v2313_v58, 3 }
 0x265   :  { %v472_v61 = vpop.f32.mrb[2].mxu1 }
 0x266   :  { %v473_v62 = vadd.f32 %v472_v61, %v2232_v37  ;;  %v474_v1 = vpop.f32.mrb[3].mxu1 }
 0x267   :  { %v475_v3 = vadd.f32 %v474_v1, %v2313_v58 }
 0x268   :  { %v482_v10 = vrot.slane %v473_v62, %v2309_v53 }
 0x269   :  { %1829 = vtanh.f32 %v475_v3 }
 0x26a   :  { %v483_v25 = vsel %vm478_vm1, %v482_v10, 0.0 }
 0x273   :  { %v1830_v6 = vpop.eup %1829 }
 0x274   :  { %554 = vmatprep.mubr.f32.mxu0 %v1830_v6 }
 0x275   :  { %555 = vmatmul.mubr.f32.vlgmr.msra.gmra.mrb[4].mxu0 %v473_v62 }
 0x276   :  { %1497 = vmatpush1.bf16.msra.mxu0 %v2136_v57 }
 0x277   :  { %1499 = vmatprep.subr.bf16.mxu0 %v2141_v60 }
 0x27a   :  { %1501 = vmatpush1.bf16.msra.mxu0 %v2143_v63 }
 0x27b   :  { %1503 = vmatprep.subr.bf16.mxu0 %v2147_v2 }
 0x27e   :  { %1505 = vmatpush1.bf16.msra.mxu0 %v2149_v5 }
 0x27f   :  { %1507 = vmatprep.subr.bf16.mxu0 %v2153_v8 }
 0x282   :  { %1509 = vmatpush1.bf16.msra.mxu0 %v2155_v11 }
 0x283   :  { %1511 = vmatprep.subr.bf16.mxu0 %v2159_v14 }
 0x286   :  { %1513 = vmatpush1.bf16.msra.mxu0 %v2161_v17 }
 0x287   :  { %1515 = vmatprep.subr.bf16.mxu0 %v2165_v20 }
 0x28a   :  { %1517 = vmatpush1.bf16.msra.mxu0 %v2167_v23 }
 0x28b   :  { %1519 = vmatprep.subr.bf16.mxu0 %v2171_v26 }
 0x28e   :  { %1521 = vmatpush1.bf16.msra.mxu0 %v2173_v29 }
 0x28f   :  { %1523 = vmatprep.subr.bf16.mxu0 %v2177_v32 }
 0x292   :  { %1525 = vmatpush1.bf16.msra.mxu0 %v2179_v35 }
 0x293   :  { %1527 = vmatprep.subr.bf16.mxu0 %v2183_v38 }
 0x296   :  { %1529 = vmatpush1.bf16.msra.mxu0 %v2185_v41 }
 0x297   :  { %1531 = vmatprep.subr.bf16.mxu0 %v2189_v44 }
 0x29a   :  { %1533 = vmatpush1.bf16.msra.mxu0 %v2191_v47 }
 0x29b   :  { %1535 = vmatprep.subr.bf16.mxu0 %v2195_v50 }
 0x29e   :  { %1537 = vmatpush1.bf16.msra.mxu0 %v2197_v55 }
 0x29f   :  { %1539 = vmatprep.subr.bf16.mxu0 %v2201_v59 }
 0x2a2   :  { %1541 = vmatpush1.bf16.msra.mxu0 %v2203_v0 }
 0x2a3   :  { %1543 = vmatprep.subr.bf16.mxu0 %v2207_v4 }
 0x2a6   :  { %1545 = vmatpush1.bf16.msra.mxu0 %v2209_v9 }
 0x2a7   :  { %1547 = vmatprep.subr.bf16.mxu0 %v2213_v13 }
 0x2aa   :  { %1549 = vmatpush1.bf16.msra.mxu0 %v2215_v18 }
 0x2ab   :  { %1551 = vmatprep.subr.bf16.mxu0 %v2219_v22 }
 0x2ae   :  { %1553 = vmatpush1.bf16.msra.mxu0 %v2221_v27 }
 0x2af   :  { %1555 = vmatprep.subr.bf16.mxu0 %v2225_v31 }
 0x2b2   :  { %1557 = vmatpush1.bf16.msra.mxu0 %v2227_v36 }
 0x2b3   :  { %1623 = vmatprep.subr.bf16.mxu0 %v2134_v54 }
 0x348   :  { %v556_v12 = vpop.f32.mrb[4].mxu0 }
 0x349   :  { %v557_v16 = vadd.f32 %v556_v12, %v486_v7  ;;  %v558_v19 = vpop.f32.mrb[5].mxu0  ;;  %v733_v12 = vrot.slane %v2313_v58, 4 }
 0x34a   :  { %v559_v21 = vadd.f32 %v558_v19, %v487_v15 }
 0x34b   :  { %v566_v24 = vrot.slane %v557_v16, %v2309_v53 }
 0x34c   :  { %1831 = vtanh.f32 %v559_v21 }
 0x34d   :  { %v567_v28 = vsel %vm562_vm2, %v566_v24, %v483_v25 }
 0x356   :  { %v1832_v30 = vpop.eup %1831 }
 0x357   :  { %636 = vmatprep.mubr.f32.mxu1 %v1832_v30 }
 0x358   :  { %637 = vmatmul.mubr.f32.vlgmr.msra.gmra.mrb[4].mxu1 %v557_v16 }
 0x359   :  { %1561 = vmatpush1.bf16.msra.mxu1 %v2136_v57 }
 0x35a   :  { %1563 = vmatprep.subr.bf16.mxu1 %v2141_v60 }
 0x35d   :  { %1565 = vmatpush1.bf16.msra.mxu1 %v2143_v63 }
 0x35e   :  { %1567 = vmatprep.subr.bf16.mxu1 %v2147_v2 }
 0x361   :  { %1569 = vmatpush1.bf16.msra.mxu1 %v2149_v5 }
 0x362   :  { %1571 = vmatprep.subr.bf16.mxu1 %v2153_v8 }
 0x365   :  { %1573 = vmatpush1.bf16.msra.mxu1 %v2155_v11 }
 0x366   :  { %1575 = vmatprep.subr.bf16.mxu1 %v2159_v14 }
 0x369   :  { %1577 = vmatpush1.bf16.msra.mxu1 %v2161_v17 }
 0x36a   :  { %1579 = vmatprep.subr.bf16.mxu1 %v2165_v20 }
 0x36d   :  { %1581 = vmatpush1.bf16.msra.mxu1 %v2167_v23 }
 0x36e   :  { %1583 = vmatprep.subr.bf16.mxu1 %v2171_v26 }
 0x371   :  { %1585 = vmatpush1.bf16.msra.mxu1 %v2173_v29 }
 0x372   :  { %1587 = vmatprep.subr.bf16.mxu1 %v2177_v32 }
 0x375   :  { %1589 = vmatpush1.bf16.msra.mxu1 %v2179_v35 }
 0x376   :  { %1591 = vmatprep.subr.bf16.mxu1 %v2183_v38 }
 0x379   :  { %1593 = vmatpush1.bf16.msra.mxu1 %v2185_v41 }
 0x37a   :  { %1595 = vmatprep.subr.bf16.mxu1 %v2189_v44 }
 0x37d   :  { %1597 = vmatpush1.bf16.msra.mxu1 %v2191_v47 }
 0x37e   :  { %1599 = vmatprep.subr.bf16.mxu1 %v2195_v50 }
 0x381   :  { %1601 = vmatpush1.bf16.msra.mxu1 %v2197_v55 }
 0x382   :  { %1603 = vmatprep.subr.bf16.mxu1 %v2201_v59 }
 0x385   :  { %1605 = vmatpush1.bf16.msra.mxu1 %v2203_v0 }
 0x386   :  { %1607 = vmatprep.subr.bf16.mxu1 %v2207_v4 }
 0x389   :  { %1609 = vmatpush1.bf16.msra.mxu1 %v2209_v9 }
 0x38a   :  { %1611 = vmatprep.subr.bf16.mxu1 %v2213_v13 }
 0x38d   :  { %1613 = vmatpush1.bf16.msra.mxu1 %v2215_v18 }
 0x38e   :  { %1615 = vmatprep.subr.bf16.mxu1 %v2219_v22 }
 0x391   :  { %1617 = vmatpush1.bf16.msra.mxu1 %v2221_v27 }
 0x392   :  { %1619 = vmatprep.subr.bf16.mxu1 %v2225_v31 }
 0x395   :  { %1621 = vmatpush1.bf16.msra.mxu1 %v2227_v36 }
 0x396   :  { %1687 = vmatprep.subr.bf16.mxu1 %v2134_v54 }
 0x42b   :  { %v638_v34 = vpop.f32.mrb[4].mxu1 }
 0x42c   :  { %v639_v40 = vadd.f32 %v638_v34, %v568_v33  ;;  %v640_v42 = vpop.f32.mrb[5].mxu1 }
 0x42d   :  { %v641_v43 = vadd.f32 %v640_v42, %v569_v39 }
 0x42e   :  { %v648_v45 = vrot.slane %v639_v40, %v2309_v53 }
 0x42f   :  { %1833 = vtanh.f32 %v641_v43 }
 0x430   :  { %v649_v46 = vsel %vm644_vm3, %v648_v45, %v567_v28 }
 0x439   :  { %v1834_v51 = vpop.eup %1833 }
 0x43a   :  { %718 = vmatprep.mubr.f32.mxu0 %v1834_v51 }
 0x43b   :  { %719 = vmatmul.mubr.f32.vlgmr.msra.gmra.mrb[6].mxu0 %v639_v40 }
 0x43c   :  { %1625 = vmatpush1.bf16.msra.mxu0 %v2136_v57 }
 0x43d   :  { %1627 = vmatprep.subr.bf16.mxu0 %v2141_v60 }
 0x440   :  { %1629 = vmatpush1.bf16.msra.mxu0 %v2143_v63 }
 0x441   :  { %1631 = vmatprep.subr.bf16.mxu0 %v2147_v2 }
 0x444   :  { %1633 = vmatpush1.bf16.msra.mxu0 %v2149_v5 }
 0x445   :  { %1635 = vmatprep.subr.bf16.mxu0 %v2153_v8 }
 0x448   :  { %1637 = vmatpush1.bf16.msra.mxu0 %v2155_v11 }
 0x449   :  { %1639 = vmatprep.subr.bf16.mxu0 %v2159_v14 }
 0x44c   :  { %1641 = vmatpush1.bf16.msra.mxu0 %v2161_v17 }
 0x44d   :  { %1643 = vmatprep.subr.bf16.mxu0 %v2165_v20 }
 0x450   :  { %1645 = vmatpush1.bf16.msra.mxu0 %v2167_v23 }
 0x451   :  { %1647 = vmatprep.subr.bf16.mxu0 %v2171_v26 }
 0x454   :  { %1649 = vmatpush1.bf16.msra.mxu0 %v2173_v29 }
 0x455   :  { %1651 = vmatprep.subr.bf16.mxu0 %v2177_v32 }
 0x458   :  { %1653 = vmatpush1.bf16.msra.mxu0 %v2179_v35 }
 0x459   :  { %1655 = vmatprep.subr.bf16.mxu0 %v2183_v38 }
 0x45c   :  { %1657 = vmatpush1.bf16.msra.mxu0 %v2185_v41 }
 0x45d   :  { %1659 = vmatprep.subr.bf16.mxu0 %v2189_v44 }
 0x460   :  { %1661 = vmatpush1.bf16.msra.mxu0 %v2191_v47 }
 0x461   :  { %1663 = vmatprep.subr.bf16.mxu0 %v2195_v50 }
 0x464   :  { %1665 = vmatpush1.bf16.msra.mxu0 %v2197_v55 }
 0x465   :  { %1667 = vmatprep.subr.bf16.mxu0 %v2201_v59 }
 0x468   :  { %1669 = vmatpush1.bf16.msra.mxu0 %v2203_v0 }
 0x469   :  { %1671 = vmatprep.subr.bf16.mxu0 %v2207_v4 }
 0x46c   :  { %1673 = vmatpush1.bf16.msra.mxu0 %v2209_v9 }
 0x46d   :  { %1675 = vmatprep.subr.bf16.mxu0 %v2213_v13 }
 0x470   :  { %1677 = vmatpush1.bf16.msra.mxu0 %v2215_v18 }
 0x471   :  { %1679 = vmatprep.subr.bf16.mxu0 %v2219_v22 }
 0x474   :  { %1681 = vmatpush1.bf16.msra.mxu0 %v2221_v27 }
 0x475   :  { %1683 = vmatprep.subr.bf16.mxu0 %v2225_v31 }
 0x478   :  { %1685 = vmatpush1.bf16.msra.mxu0 %v2227_v36 }
 0x479   :  { %1751 = vmatprep.subr.bf16.mxu0 %v2134_v54  ;;  %v732_v54 = vrot.slane %v2232_v37, 4 }
 0x50e   :  { %v720_v49 = vpop.f32.mrb[6].mxu0 }
 0x50f   :  { %v721_v61 = vadd.f32 %v720_v49, %v650_v48  ;;  %v722_v62 = vpop.f32.mrb[7].mxu0 }
 0x510   :  { %v723_v1 = vadd.f32 %v722_v62, %v651_v56 }
 0x511   :  { %v730_v3 = vrot.slane %v721_v61, %v2309_v53 }
 0x512   :  { %1835 = vtanh.f32 %v723_v1 }
 0x513   :  { %v731_v6 = vsel %vm726_vm4, %v730_v3, %v649_v46 }
 0x51c   :  { %v1836_v7 = vpop.eup %1835 }
 0x51d   :  { %800 = vmatprep.mubr.f32.mxu1 %v1836_v7 }
 0x51e   :  { %801 = vmatmul.mubr.f32.vlgmr.msra.gmra.mrb[6].mxu1 %v721_v61 }
 0x51f   :  { %1689 = vmatpush1.bf16.msra.mxu1 %v2136_v57 }
 0x520   :  { %1691 = vmatprep.subr.bf16.mxu1 %v2141_v60 }
 0x523   :  { %1693 = vmatpush1.bf16.msra.mxu1 %v2143_v63 }
 0x524   :  { %1695 = vmatprep.subr.bf16.mxu1 %v2147_v2 }
 0x527   :  { %1697 = vmatpush1.bf16.msra.mxu1 %v2149_v5 }
 0x528   :  { %1699 = vmatprep.subr.bf16.mxu1 %v2153_v8 }
 0x52b   :  { %1701 = vmatpush1.bf16.msra.mxu1 %v2155_v11 }
 0x52c   :  { %1703 = vmatprep.subr.bf16.mxu1 %v2159_v14 }
 0x52f   :  { %1705 = vmatpush1.bf16.msra.mxu1 %v2161_v17 }
 0x530   :  { %1707 = vmatprep.subr.bf16.mxu1 %v2165_v20 }
 0x533   :  { %1709 = vmatpush1.bf16.msra.mxu1 %v2167_v23 }
 0x534   :  { %1711 = vmatprep.subr.bf16.mxu1 %v2171_v26 }
 0x537   :  { %1713 = vmatpush1.bf16.msra.mxu1 %v2173_v29 }
 0x538   :  { %1715 = vmatprep.subr.bf16.mxu1 %v2177_v32 }
 0x53b   :  { %1717 = vmatpush1.bf16.msra.mxu1 %v2179_v35 }
 0x53c   :  { %1719 = vmatprep.subr.bf16.mxu1 %v2183_v38 }
 0x53f   :  { %1721 = vmatpush1.bf16.msra.mxu1 %v2185_v41 }
 0x540   :  { %1723 = vmatprep.subr.bf16.mxu1 %v2189_v44 }
 0x543   :  { %1725 = vmatpush1.bf16.msra.mxu1 %v2191_v47 }
 0x544   :  { %1727 = vmatprep.subr.bf16.mxu1 %v2195_v50 }
 0x547   :  { %1729 = vmatpush1.bf16.msra.mxu1 %v2197_v55 }
 0x548   :  { %1731 = vmatprep.subr.bf16.mxu1 %v2201_v59 }
 0x54b   :  { %1733 = vmatpush1.bf16.msra.mxu1 %v2203_v0 }
 0x54c   :  { %1735 = vmatprep.subr.bf16.mxu1 %v2207_v4 }
 0x54f   :  { %1737 = vmatpush1.bf16.msra.mxu1 %v2209_v9 }
 0x550   :  { %1739 = vmatprep.subr.bf16.mxu1 %v2213_v13 }
 0x553   :  { %1741 = vmatpush1.bf16.msra.mxu1 %v2215_v18 }
 0x554   :  { %1743 = vmatprep.subr.bf16.mxu1 %v2219_v22 }
 0x557   :  { %1745 = vmatpush1.bf16.msra.mxu1 %v2221_v27 }
 0x558   :  { %1747 = vmatprep.subr.bf16.mxu1 %v2225_v31 }
 0x55b   :  { %1749 = vmatpush1.bf16.msra.mxu1 %v2227_v36 }
 0x5f1   :  { %v802_v10 = vpop.f32.mrb[6].mxu1 }
 0x5f2   :  { %v803_v15 = vadd.f32 %v802_v10, %v732_v54  ;;  %v804_v16 = vpop.f32.mrb[7].mxu1 }
 0x5f3   :  { %v805_v19 = vadd.f32 %v804_v16, %v733_v12 }
 0x5f4   :  { %v812_v21 = vrot.slane %v803_v15, %v2309_v53 }
 0x5f5   :  { %1837 = vtanh.f32 %v805_v19 }
 0x5f6   :  { %v813_v24 = vsel %vm808_vm5, %v812_v21, %v731_v6 }
 0x5ff   :  { %v1838_v25 = vpop.eup %1837 }
 0x600   :  { %882 = vmatprep.mubr.f32.mxu0 %v1838_v25 }
 0x601   :  { %883 = vmatmul.mubr.f32.vlgmr.msra.gmra.mrb[8].mxu0 %v803_v15 }
 0x602   :  { %1753 = vmatpush1.bf16.msra.mxu0 %v2136_v57  ;;  %v814_v57 = vrot.slane %v2232_v37, 5 }
 0x603   :  { %1755 = vmatprep.subr.bf16.mxu0 %v2141_v60 }
 0x606   :  { %1757 = vmatpush1.bf16.msra.mxu0 %v2143_v63  ;;  %v815_v63 = vrot.slane %v2313_v58, 5 }
 0x607   :  { %1759 = vmatprep.subr.bf16.mxu0 %v2147_v2 }
 0x60a   :  { %1761 = vmatpush1.bf16.msra.mxu0 %v2149_v5 }
 0x60b   :  { %1763 = vmatprep.subr.bf16.mxu0 %v2153_v8 }
 0x60e   :  { %1765 = vmatpush1.bf16.msra.mxu0 %v2155_v11 }
 0x60f   :  { %1767 = vmatprep.subr.bf16.mxu0 %v2159_v14 }
 0x612   :  { %1769 = vmatpush1.bf16.msra.mxu0 %v2161_v17 }
 0x613   :  { %1771 = vmatprep.subr.bf16.mxu0 %v2165_v20  ;;  %v896_v20 = vrot.slane %v2232_v37, 6 }
 0x616   :  { %1773 = vmatpush1.bf16.msra.mxu0 %v2167_v23 }
 0x617   :  { %1775 = vmatprep.subr.bf16.mxu0 %v2171_v26  ;;  %v897_v26 = vrot.slane %v2313_v58, 6 }
 0x61a   :  { %1777 = vmatpush1.bf16.msra.mxu0 %v2173_v29 }
 0x61b   :  { %1779 = vmatprep.subr.bf16.mxu0 %v2177_v32 }
 0x61e   :  { %1781 = vmatpush1.bf16.msra.mxu0 %v2179_v35 }
 0x61f   :  { %1783 = vmatprep.subr.bf16.mxu0 %v2183_v38 }
 0x622   :  { %1785 = vmatpush1.bf16.msra.mxu0 %v2185_v41 }
 0x623   :  { %1787 = vmatprep.subr.bf16.mxu0 %v2189_v44 }
 0x626   :  { %1789 = vmatpush1.bf16.msra.mxu0 %v2191_v47  ;;  %v978_v47 = vrot.slane %v2232_v37, 7 }
 0x627   :  { %1791 = vmatprep.subr.bf16.mxu0 %v2195_v50 }
 0x62a   :  { %1793 = vmatpush1.bf16.msra.mxu0 %v2197_v55 }
 0x62b   :  { %1795 = vmatprep.subr.bf16.mxu0 %v2201_v59 }
 0x62e   :  { %1797 = vmatpush1.bf16.msra.mxu0 %v2203_v0 }
 0x62f   :  { %1799 = vmatprep.subr.bf16.mxu0 %v2207_v4 }
 0x632   :  { %1801 = vmatpush1.bf16.msra.mxu0 %v2209_v9 }
 0x633   :  { %1803 = vmatprep.subr.bf16.mxu0 %v2213_v13 }
 0x636   :  { %1805 = vmatpush1.bf16.msra.mxu0 %v2215_v18 }
 0x637   :  { %1807 = vmatprep.subr.bf16.mxu0 %v2219_v22 }
 0x63a   :  { %1809 = vmatpush1.bf16.msra.mxu0 %v2221_v27 }
 0x63b   :  { %1811 = vmatprep.subr.bf16.mxu0 %v2225_v31 }
 0x63e   :  { %1813 = vmatpush1.bf16.msra.mxu0 %v2227_v36 }
 0x6d4   :  { %v884_v60 = vpop.f32.mrb[8].mxu0 }
 0x6d5   :  { %v885_v2 = vadd.f32 %v884_v60, %v814_v57  ;;  %v886_v5 = vpop.f32.mrb[9].mxu0 }
 0x6d6   :  { %v887_v8 = vadd.f32 %v886_v5, %v815_v63 }
 0x6d7   :  { %v894_v11 = vrot.slane %v885_v2, %v2309_v53 }
 0x6d8   :  { %1839 = vtanh.f32 %v887_v8 }
 0x6d9   :  { %v895_v14 = vsel %vm890_vm6, %v894_v11, %v813_v24 }
 0x6e2   :  { %v1840_v17 = vpop.eup %1839 }
 0x6e3   :  { %964 = vmatprep.mubr.f32.mxu1 %v1840_v17 }
 0x6e4   :  { %965 = vmatmul.mubr.f32.vlgmr.msra.gmra.mrb[8].mxu1 %v885_v2 }
 0x7b7   :  { %v966_v23 = vpop.f32.mrb[8].mxu1 }
 0x7b8   :  { %v967_v29 = vadd.f32 %v966_v23, %v896_v20  ;;  %v968_v32 = vpop.f32.mrb[9].mxu1 }
 0x7b9   :  { %v969_v35 = vadd.f32 %v968_v32, %v897_v26 }
 0x7ba   :  { %v976_v38 = vrot.slane %v967_v29, %v2309_v53 }
 0x7bb   :  { %1841 = vtanh.f32 %v969_v35 }
 0x7bc   :  { %v977_v41 = vsel %vm972_vm7, %v976_v38, %v895_v14 }
 0x7c5   :  { %v1842_v44 = vpop.eup %1841 }
 0x7c6   :  { %1044 = vmatprep.mubr.f32.mxu0 %v1842_v44 }
 0x7c7   :  { %1045 = vmatmul.mubr.f32.vlgmr.msra.gmra.mrb[10].mxu0 %v967_v29 }
 0x89a   :  { %v1046_v50 = vpop.f32.mrb[10].mxu0 }
 0x89b   :  { %v1047_v55 = vadd.f32 %v1046_v50, %v978_v47  ;;  %v1048_v59 = vpop.f32.mrb[11].mxu0 }
 0x89d   :  { %v1054_v0 = vrot.slane %v1047_v55, %v2309_v53 }
 0x89f   :  { %v1055_v4 = vsel %vm1050_vm8, %v1054_v0, %v977_v41 }
 0x8a0   :  { %1056 = vst [vmem:[#allocation11] sm:$0xff] %v1055_v4 }
 0x8a1   :  { %1964 = shalt.err (!%p1961_p2)
}
 0x8a2   :  { %s1965_s14 = scalar_lea.hbm %s2522_s6, 128 }
 0x8a3   :  { %p1966_p3 = scmp.ne.s32.totalorder %s2522_s6, %s1965_s14  ;;  %p1969_p4 = scmp.lt.u32.totalorder %s1965_s14, %s2522_s6 }
 0x8a5   :  { %p1971_p5 = pnand %p1969_p4, %p1966_p3 }
 0x8a7   :  { %1974 = shalt.err (!%p1971_p5)
}
 0x8a8   :  { %1066 = dma.vmem_to_hbm [thread:$0]  %s1064_s9, 128, %s2522_s6, [#allocation4]  }
 0x8a9   :  { %1981 = dma.done.wait [#allocation4], 128  }
 0x8aa   :  { %1982 = vsyncadd [#allocation4], 4294967168 }
 0x8ab   :  { %1070 = vsyncpa [#allocation3], 1 }
 0x8ac   :  { %1071 = vsyncpa [#allocation6], 1 }
 0x8ad   :  { %1072 = vsyncpa [#allocation9], 1 }
 0x8ae   :  { %1073 = vsyncpa [#allocation4], 1 }

</bundles_post_ra>
